<compile_context>
chip_gen: v5e
topology: v5e:2x2
jax: 0.10.0
libtpu: 0.0.40
codegen_flags: <defaults>
</compile_context>

<pallas_src>
import functools

import jax
import jax.numpy as jnp
from jax.experimental import pallas as pl
from jax.experimental.pallas import tpu as pltpu

EPS = 1e-8
_MIB = 1 << 20


# ----------------------------------------------------------------------------
# Generation-aware VMEM budgets
# ----------------------------------------------------------------------------
def _vmem_capacity_bytes():
    try:
        info = pltpu.get_tpu_info()
        cap = getattr(info, "vmem_capacity_bytes", None)
        if cap:
            return int(cap)
    except Exception:
        pass
    return 64 * _MIB  # conservative fallback (v7x-sized)


def _budgets():
    cap = _vmem_capacity_bytes()
    if cap >= 96 * _MIB:
        # v5e / v6e: 128 MiB physical VMEM.
        return dict(vmem_limit=110 * _MIB, fused_gate=14 * _MIB,
                    tile_budget=10 * _MIB)
    # v7x: 64 MiB physical VMEM per TensorCore.
    return dict(vmem_limit=56 * _MIB, fused_gate=7 * _MIB,
                tile_budget=5 * _MIB)


# ----------------------------------------------------------------------------
# Kernels
# ----------------------------------------------------------------------------
def _gln_fused_kernel(y_ref, gamma_ref, beta_ref, o_ref, *, inv_count):
    """Single-pass gLN for one batch element's full (d1, d2) slab."""
    y = y_ref[...].astype(jnp.float32)                       # (1, d1, d2)
    # Fused single sweep: sum and sum-of-squares together.
    s = jnp.sum(y, axis=(1, 2), keepdims=True)               # (1, 1, 1)
    ss = jnp.sum(y * y, axis=(1, 2), keepdims=True)          # (1, 1, 1)
    mean = s * inv_count
    var = jnp.maximum(ss * inv_count - mean * mean, 0.0)
    inv_std = jax.lax.rsqrt(var + EPS)                       # EUP, ~free slot
    gamma = gamma_ref[...].astype(jnp.float32)               # (1,N,1) or (1,1,N)
    beta = beta_ref[...].astype(jnp.float32)
    scale = gamma * inv_std                                  # hoisted affine
    shift = beta - mean * scale
    o_ref[...] = (y * scale + shift).astype(o_ref.dtype)     # 1 mul + 1 add / elem


def _gln_stats_kernel(y_ref, gamma_ref, beta_ref, scale_ref, shift_ref,
                      sum_acc, sq_acc, *, inv_count):
    """Pass 1: accumulate sum/sumsq over time tiles, emit per-batch scale/shift.

    Accumulators are block-shaped (same shape as the y tile): the per-step work
    is pure elementwise VPU adds; the only cross-lane/sublane reduce happens
    once in the finalize step.
    """
    k = pl.program_id(1)

    @pl.when(k == 0)
    def _init():
        sum_acc[...] = jnp.zeros_like(sum_acc)
        sq_acc[...] = jnp.zeros_like(sq_acc)

    y = y_ref[...].astype(jnp.float32)
    sum_acc[...] += y
    sq_acc[...] += y * y

    @pl.when(k == pl.num_programs(1) - 1)
    def _finalize():
        s = jnp.sum(sum_acc[...], axis=(1, 2), keepdims=True)   # (1,1,1)
        ss = jnp.sum(sq_acc[...], axis=(1, 2), keepdims=True)   # (1,1,1)
        mean = s * inv_count
        # NOTE: E[x^2] - E[x]^2 is less stable than the centered form when
        # |mean| >> std; f32 accumulation matches the centered reference to
        # ~1e-6 for typical gLN activations.
        var = jnp.maximum(ss * inv_count - mean * mean, 0.0)
        inv_std = jax.lax.rsqrt(var + EPS)
        gamma = gamma_ref[...].astype(jnp.float32)
        beta = beta_ref[...].astype(jnp.float32)
        scale = gamma * inv_std
        shift = beta - mean * scale
        scale_ref[...] = scale
        shift_ref[...] = shift


def _gln_apply_kernel(y_ref, scale_ref, shift_ref, o_ref):
    """Pass 2: out = y * scale + shift (per-element: one mul + one add)."""
    y = y_ref[...].astype(jnp.float32)
    o_ref[...] = (y * scale_ref[...] + shift_ref[...]).astype(o_ref.dtype)


# ----------------------------------------------------------------------------
# Wrapper
# ----------------------------------------------------------------------------
def _pick_tile(full, unit, other, budget_bytes):
    """Largest multiple of `unit` dividing `full` with other*tile*4 <= budget."""
    if full * other * 4 <= budget_bytes:
        return full
    target = max(unit, (budget_bytes // (other * 4)) // unit * unit)
    t = min(target, (full // unit) * unit)
    while t >= unit:
        if full % t == 0:
            return t
        t -= unit
    # No clean multiple-of-unit divisor of `full`: fall back to the full axis
    # as a single block.  vmem_limit_bytes is set explicitly, so this only
    # matters for enormous ragged slabs.
    # TODO(synk): cdiv-style grid + masked tail for ragged time axes.
    return full


def global_layer_norm(y, gamma, beta, shape="BDT", *,
                      fused_slab_bytes=None, tile_budget_bytes=None):
    """Pallas gLN.

    Args:
      y: [M, N, K] if shape == 'BDT', else [M, K, N].
      gamma, beta: [1, C, 1] per-channel affine parameters.
      shape: 'BDT' or 'BTD' (matches the PyTorch module).
      fused_slab_bytes: override for the fused-path f32 slab gate (None -> auto).
      tile_budget_bytes: override for the tiled-path per-block f32 budget
        (None -> auto, generation-aware).
    Returns:
      Same shape/dtype as y.
    """
    assert shape in ("BDT", "BTD")
    M, d1, d2 = y.shape
    budgets = _budgets()
    vmem_limit = budgets["vmem_limit"]
    fused_gate = budgets["fused_gate"] if fused_slab_bytes is None else fused_slab_bytes
    tile_budget = budgets["tile_budget"] if tile_budget_bytes is None else tile_budget_bytes

    itemsize = jnp.dtype(y.dtype).itemsize

    if shape == "BDT":
        N = d1                      # channel on sublane axis
        unit = 128                  # tile the lane (time) axis
        full_tiled, other = d2, d1
        gamma_k, beta_k = gamma, beta
        param_block = (1, N, 1)
        stat_shape = (M, N, 1)
    else:
        N = d2                      # channel on lane axis
        # Dtype-aware sublane min-tile: 8 f32 / 16 bf16 / 32 int8-fp8.
        unit = 8 * max(1, 4 // itemsize)
        full_tiled, other = d1, d2
        gamma_k = gamma.reshape(1, 1, N)    # O(C) reshape, no tensor transpose
        beta_k = beta.reshape(1, 1, N)
        param_block = (1, 1, N)
        stat_shape = (M, 1, N)

    assert gamma.shape == (1, N, 1) and beta.shape == (1, N, 1)

    inv_count = 1.0 / float(d1 * d2)
    slab_f32_bytes = d1 * d2 * 4

    compiler_params_1d = pltpu.CompilerParams(
        dimension_semantics=("parallel",), vmem_limit_bytes=vmem_limit)

    # ---------------- fused fast path: full slab fits the budget ------------
    # Live VMEM on this path is ~6-7x the f32 slab (2x double-buffered input +
    # 2x output + f32 temporaries), which the generation-aware gate accounts
    # for; vmem_limit_bytes is raised to match.
    if slab_f32_bytes <= fused_gate:
        kern = functools.partial(_gln_fused_kernel, inv_count=inv_count)
        return pl.pallas_call(
            kern,
            out_shape=jax.ShapeDtypeStruct((M, d1, d2), y.dtype),
            grid_spec=pltpu.PrefetchScalarGridSpec(
                num_scalar_prefetch=0,
                grid=(M,),
                in_specs=[
                    pl.BlockSpec((1, d1, d2), lambda b: (b, 0, 0)),
                    pl.BlockSpec(param_block, lambda b: (0, 0, 0)),
                    pl.BlockSpec(param_block, lambda b: (0, 0, 0)),
                ],
                out_specs=pl.BlockSpec((1, d1, d2), lambda b: (b, 0, 0)),
            ),
            compiler_params=compiler_params_1d,
        )(y, gamma_k, beta_k)

    # ---------------- tiled two-pass path ------------------------------------
    tile = _pick_tile(full_tiled, unit, other, tile_budget)
    n_tiles = full_tiled // tile

    if shape == "BDT":
        y_block = (1, N, tile)
        y_map = lambda b, k: (b, 0, k)
    else:
        y_block = (1, tile, N)
        y_map = lambda b, k: (b, k, 0)

    # Pass 1: per-batch scale/shift (f32), reduction axis is 'arbitrary'.
    stats_kern = functools.partial(_gln_stats_kernel, inv_count=inv_count)
    scale, shift = pl.pallas_call(
        stats_kern,
        out_shape=(jax.ShapeDtypeStruct(stat_shape, jnp.float32),
                   jax.ShapeDtypeStruct(stat_shape, jnp.float32)),
        grid_spec=pltpu.PrefetchScalarGridSpec(
            num_scalar_prefetch=0,
            grid=(M, n_tiles),
            in_specs=[
                pl.BlockSpec(y_block, y_map),
                pl.BlockSpec(param_block, lambda b, k: (0, 0, 0)),
                pl.BlockSpec(param_block, lambda b, k: (0, 0, 0)),
            ],
            out_specs=(pl.BlockSpec(param_block, lambda b, k: (b, 0, 0)),
                       pl.BlockSpec(param_block, lambda b, k: (b, 0, 0))),
            scratch_shapes=[pltpu.VMEM(y_block, jnp.float32),
                            pltpu.VMEM(y_block, jnp.float32)],
        ),
        compiler_params=pltpu.CompilerParams(
            dimension_semantics=("parallel", "arbitrary"),
            vmem_limit_bytes=vmem_limit),
    )(y, gamma_k, beta_k)

    # Pass 2: embarrassingly parallel apply.
    out = pl.pallas_call(
        _gln_apply_kernel,
        out_shape=jax.ShapeDtypeStruct((M, d1, d2), y.dtype),
        grid_spec=pltpu.PrefetchScalarGridSpec(
            num_scalar_prefetch=0,
            grid=(M, n_tiles),
            in_specs=[
                pl.BlockSpec(y_block, y_map),
                pl.BlockSpec(param_block, lambda b, k: (b, 0, 0)),
                pl.BlockSpec(param_block, lambda b, k: (b, 0, 0)),
            ],
            out_specs=pl.BlockSpec(y_block, y_map),
        ),
        compiler_params=pltpu.CompilerParams(
            dimension_semantics=("parallel", "parallel"),
            vmem_limit_bytes=vmem_limit),
    )(y, scale, shift)
    return out


# ----------------------------------------------------------------------------
# Reference & test
# ----------------------------------------------------------------------------
def reference_gln(y, gamma, beta, shape="BDT"):
    # Pure-JAX reference matching the PyTorch forward exactly.
    if shape == "BTD":
        y = jnp.transpose(y, (0, 2, 1))
    mean = jnp.mean(y, axis=(1, 2), keepdims=True)
    var = jnp.mean((y - mean) ** 2, axis=(1, 2), keepdims=True)
    out = gamma * (y - mean) / jnp.power(var + EPS, 0.5) + beta
    if shape == "BTD":
        out = jnp.transpose(out, (0, 2, 1))
    return out


if __name__ == "__main__":
    key = jax.random.PRNGKey(0)
    M, N, K = 2, 4, 16  # batch, channel, time

    y = jax.random.normal(key, (M, N, K), dtype=jnp.float32)
    # reset_parameters(): gamma = 1, beta = 0.
    gamma = jnp.ones((1, N, 1), dtype=jnp.float32)
    beta = jnp.zeros((1, N, 1), dtype=jnp.float32)

    # --- BDT, fused fast path ---
    out = jax.block_until_ready(global_layer_norm(y, gamma, beta, shape="BDT"))
    ref = reference_gln(y, gamma, beta, shape="BDT")
    assert out.shape == y.shape and out.dtype == y.dtype
    assert jnp.allclose(out, ref, atol=1e-5, rtol=1e-5), "BDT fused mismatch"

    # --- BDT, forced tiled two-pass path (K multiple of 128, non-trivial affine) ---
    K2 = 256
    y2 = jax.random.normal(jax.random.PRNGKey(1), (M, N, K2), dtype=jnp.float32)
    gamma2 = 1.0 + 0.1 * jax.random.normal(jax.random.PRNGKey(2), (1, N, 1), dtype=jnp.float32)
    beta2 = 0.1 * jax.random.normal(jax.random.PRNGKey(3), (1, N, 1), dtype=jnp.float32)
    out2 = jax.block_until_ready(
        global_layer_norm(y2, gamma2, beta2, shape="BDT",
                          fused_slab_bytes=0, tile_budget_bytes=2048))
    ref2 = reference_gln(y2, gamma2, beta2, shape="BDT")
    assert jnp.allclose(out2, ref2, atol=1e-5, rtol=1e-5), "BDT tiled mismatch"

    # --- BTD, fused fast path (no wrapper transposes) ---
    y_btd = jnp.transpose(y, (0, 2, 1))  # [M, K, N]
    out3 = jax.block_until_ready(global_layer_norm(y_btd, gamma, beta, shape="BTD"))
    ref3 = reference_gln(y_btd, gamma, beta, shape="BTD")
    assert jnp.allclose(out3, ref3, atol=1e-5, rtol=1e-5), "BTD fused mismatch"

    # --- BTD, forced tiled two-pass path (time axis tiled in multiples of 8) ---
    out4 = jax.block_until_ready(
        global_layer_norm(y_btd, gamma2, beta2, shape="BTD",
                          fused_slab_bytes=0, tile_budget_bytes=128))
    ref4 = reference_gln(y_btd, gamma2, beta2, shape="BTD")
    assert jnp.allclose(out4, ref4, atol=1e-5, rtol=1e-5), "BTD tiled mismatch"

    print("KERNEL_OK")
</pallas_src>

<mosaic_0001>
module attributes {stable_mosaic.version = 11 : i64} {
  func.func @_gln_fused_kernel(%arg0: i32, %arg1: memref<1x4x16xf32, #tpu.memory_space<vmem>>, %arg2: memref<1x4x1xf32, #tpu.memory_space<vmem>>, %arg3: memref<1x4x1xf32, #tpu.memory_space<vmem>>, %arg4: memref<1x4x16xf32, #tpu.memory_space<vmem>>) attributes {dimension_semantics = [#tpu.dimension_semantics<parallel>], iteration_bounds = array<i64: 2>, scalar_prefetch = 0 : i64, scratch_operands = 0 : i64, tpu.core_type = #tpu.core_type<tc>, window_params = [{transform_indices = @transform_0, window_bounds = array<i64: 1, 4, 16>}, {pipeline_mode = #tpu.pipeline_mode<synchronous>, transform_indices = @transform_1, window_bounds = array<i64: 1, 4, 1>}, {pipeline_mode = #tpu.pipeline_mode<synchronous>, transform_indices = @transform_2, window_bounds = array<i64: 1, 4, 1>}, {transform_indices = @transform_3, window_bounds = array<i64: 1, 4, 16>}]} {
    %c0 = arith.constant 0 : index
    %c0_0 = arith.constant 0 : index
    %c0_1 = arith.constant 0 : index
    %0 = vector.load %arg1[%c0, %c0_0, %c0_1] : memref<1x4x16xf32, #tpu.memory_space<vmem>>, vector<1x4x16xf32>
    %cst = arith.constant dense<0.000000e+00> : vector<1xf32>
    %1 = vector.multi_reduction <add>, %0, %cst [1, 2] : vector<1x4x16xf32> to vector<1xf32>
    %2 = vector.shape_cast %1 : vector<1xf32> to vector<1x1x1xf32>
    %3 = arith.mulf %0, %0 : vector<1x4x16xf32>
    %cst_2 = arith.constant dense<0.000000e+00> : vector<1xf32>
    %4 = vector.multi_reduction <add>, %3, %cst_2 [1, 2] : vector<1x4x16xf32> to vector<1xf32>
    %5 = vector.shape_cast %4 : vector<1xf32> to vector<1x1x1xf32>
    %cst_3 = arith.constant 1.562500e-02 : f32
    %6 = vector.broadcast %cst_3 : f32 to vector<1x1x1xf32>
    %7 = arith.mulf %2, %6 : vector<1x1x1xf32>
    %cst_4 = arith.constant 1.562500e-02 : f32
    %8 = vector.broadcast %cst_4 : f32 to vector<1x1x1xf32>
    %9 = arith.mulf %5, %8 : vector<1x1x1xf32>
    %10 = arith.mulf %7, %7 : vector<1x1x1xf32>
    %11 = arith.subf %9, %10 : vector<1x1x1xf32>
    %cst_5 = arith.constant 0.000000e+00 : f32
    %12 = vector.broadcast %cst_5 : f32 to vector<1x1x1xf32>
    %13 = arith.maximumf %11, %12 : vector<1x1x1xf32>
    %cst_6 = arith.constant 9.99999993E-9 : f32
    %14 = vector.broadcast %cst_6 : f32 to vector<1x1x1xf32>
    %15 = arith.addf %13, %14 : vector<1x1x1xf32>
    %16 = math.rsqrt %15 : vector<1x1x1xf32>
    %c0_7 = arith.constant 0 : index
    %c0_8 = arith.constant 0 : index
    %c0_9 = arith.constant 0 : index
    %17 = vector.load %arg2[%c0_7, %c0_8, %c0_9] : memref<1x4x1xf32, #tpu.memory_space<vmem>>, vector<1x4x1xf32>
    %c0_10 = arith.constant 0 : index
    %c0_11 = arith.constant 0 : index
    %c0_12 = arith.constant 0 : index
    %18 = vector.load %arg3[%c0_10, %c0_11, %c0_12] : memref<1x4x1xf32, #tpu.memory_space<vmem>>, vector<1x4x1xf32>
    %19 = vector.broadcast %16 : vector<1x1x1xf32> to vector<1x4x1xf32>
    %20 = arith.mulf %17, %19 : vector<1x4x1xf32>
    %21 = vector.broadcast %7 : vector<1x1x1xf32> to vector<1x4x1xf32>
    %22 = arith.mulf %21, %20 : vector<1x4x1xf32>
    %23 = arith.subf %18, %22 : vector<1x4x1xf32>
    %24 = vector.broadcast %20 : vector<1x4x1xf32> to vector<1x4x16xf32>
    %25 = arith.mulf %0, %24 : vector<1x4x16xf32>
    %26 = vector.broadcast %23 : vector<1x4x1xf32> to vector<1x4x16xf32>
    %27 = arith.addf %25, %26 : vector<1x4x16xf32>
    %c0_13 = arith.constant 0 : index
    %c0_14 = arith.constant 0 : index
    %c0_15 = arith.constant 0 : index
    %28 = vector.load %arg4[%c0_13, %c0_14, %c0_15] : memref<1x4x16xf32, #tpu.memory_space<vmem>>, vector<1x4x16xf32>
    tpu.vector_store %arg4[%c0_13, %c0_14, %c0_15], %27 {strides = array<i32>} : memref<1x4x16xf32, #tpu.memory_space<vmem>>, vector<1x4x16xf32>,
    return
  }
  func.func @transform_0(%arg0: i32) -> (i32, i32, i32) {
    %c0_i32 = arith.constant 0 : i32
    %c0_i32_0 = arith.constant 0 : i32
    %c0_i32_1 = arith.constant 0 : i32
    return %arg0, %c0_i32, %c0_i32_0 : i32, i32, i32
  }
  func.func @transform_1(%arg0: i32) -> (i32, i32, i32) {
    %c0_i32 = arith.constant 0 : i32
    %c0_i32_0 = arith.constant 0 : i32
    %c0_i32_1 = arith.constant 0 : i32
    %c0_i32_2 = arith.constant 0 : i32
    return %c0_i32, %c0_i32_0, %c0_i32_1 : i32, i32, i32
  }
  func.func @transform_2(%arg0: i32) -> (i32, i32, i32) {
    %c0_i32 = arith.constant 0 : i32
    %c0_i32_0 = arith.constant 0 : i32
    %c0_i32_1 = arith.constant 0 : i32
    %c0_i32_2 = arith.constant 0 : i32
    return %c0_i32, %c0_i32_0, %c0_i32_1 : i32, i32, i32
  }
  func.func @transform_3(%arg0: i32) -> (i32, i32, i32) {
    %c0_i32 = arith.constant 0 : i32
    %c0_i32_0 = arith.constant 0 : i32
    %c0_i32_1 = arith.constant 0 : i32
    return %arg0, %c0_i32, %c0_i32_0 : i32, i32, i32
  }
}

</mosaic_0001>

<bundles_post_ra>
// kernel: tpu_custom_call.1
= control target key start
LH: loop header
LB: loop body
LE: loop exit
PB: predicated region body
PF: predicated region fallthrough
CT: control target
= control target key end

     0   :  { %8 = vsyncpa [#allocation3], 0  ;;  %s529_s0 = inlined_call_operand.vmem [shape: f32[2,4,16], index: 0, kind: input, shape index: {}]   ;;  %s530_s1 = inlined_call_operand.vmem [shape: f32[1,4,1], index: 1, kind: input, shape index: {}]   ;;  %s531_s2 = inlined_call_operand.vmem [shape: f32[1,4,1], index: 2, kind: input, shape index: {}]   ;;  %s532_s3 = inlined_call_operand.hbm [shape: f32[2,4,16], index: 3, kind: output, shape index: {}]  }
   0x1   :  { %10 = vsyncpa [#allocation3 + $0x1], 0  ;;  %s435_s12 = smov 0   ;;  %s437_s13 = smov 0  }
   0x2   :  { %s439_s14 = smov 0   ;;  %s441_s15 = smov 0  }
   0x3 LB: > { %s456_s16 = sadd.s32 4294967295, %s412_s15   ;;  %s296_s17 = sadd.s32 4294967294, %s412_s15   ;;  %s412_s15 = sphi %s441_s15, %s538_s15   ;;  %s408_s14 = sphi %s439_s14, %s537_s14   ;;  %s404_s13 = sphi %s437_s13, %s536_s13   ;;  %s400_s12 = sphi %s435_s12, %s535_s12  }
   0x4   : > { %s460_s18 = sadd.s32 1, %s412_s15   ;;  %s91_s19 = sadd.s32 1, %s408_s14 }
   0x5   : > { %s88_s20 = ssub.s32 %s412_s15, %s460_s18  ;;  %p101_p0 = scmp.ne.s32.totalorder %s408_s14, %s404_s13 }
   0x6   : > { %p89_p1 = scmp.eq.s32.totalorder %s88_s20, 0  ;;  %p102_p2 = scmp.eq.s32.totalorder %s456_s16, 1 }
   0x7   : > { %p107_p3 = scmp.ne.s32.totalorder %s404_s13, %s400_s12  ;;  %p108_p4 = scmp.eq.s32.totalorder %s296_s17, 1 }
   0x8   : > { %s471_s21 = scalar_select %p89_p1, %s408_s14, %s91_s19  }
   0x9   : > { %p473_p5 = por %p102_p2, %p101_p0  ;;  %p477_p6 = por %p108_p4, %p107_p3 }
   0xa   : > { %p299_p7 = scmp.ge.s32.totalorder %s412_s15, 1  ;;  %p139_p8 = scmp.lt.s32.totalorder %s412_s15, 3 }
   0xc   : > { %p140_p9 = pnand %p299_p7, %p139_p8 }
   0xd   : > { %p162_p10 = scmp.lt.s32.totalorder (!%p140_p9), %s456_s16, 1  ;;  %s159_s6 = sand.u32 (!%p140_p9), 1, %s404_s13  }
   0xe   : > { %143 = sbr.rel (%p140_p9) target bundleno = 317 (0x13d), region = 32  ;;  %s300_s7 = sshll.u32 (!%p140_p9), %s159_s6, 2 }
   0xf   : > { %s303_s8 = sshll.u32 (!%p140_p9), %s456_s16, 2  ;;  %s161_s17 = scalar_lea.vmem (!%p140_p9), [#allocation2], %s300_s7 }
  0x10   : > { %s232_s11 = scalar_lea.hbm (!%p140_p9), %s532_s3, %s303_s8  ;;  %s234_s19 = sshll.u32 (!%p140_p9), %s161_s17, 4  ;;  %s235_s19 = int_to_ptr.vmem [resolvable:$true] %s234_s19 }
  0x11   : > { %s236_s20 = sshll.u32 (!%p140_p9), %s232_s11, 4  ;;  %s237_s20 = int_to_ptr.hbm [resolvable:$true] %s236_s20 }
  0x13   : > { %s163_s24 = scalar_select %p162_p10, %s456_s16, 1  ;;  %vm167_vm0 = vcmask 125952   ;;  %v414_v4 = vmov 0   ;;  %v203_v31 = vld [vmem:[%s530_s1] sm:$0xf] }
  0x14   : > { %346 = vset.pattern.permute.xlu1 %v414_v4  ;;  %347 = vset.pattern.permute.xlu0 %v414_v4  ;;  %v204_v35 = vld [vmem:[%s531_s2] sm:$0xf] }
  0x15   : > { %s301_s25 = sshll.u32 %s163_s24, 2  ;;  %s222_s24 = scalar_lea.sflag [#allocation3], %s159_s6 }
  0x16   : > { %s165_s28 = scalar_lea.vmem %s529_s0, %s301_s25  ;;  %s364_s25 = sshra.s32 %s237_s20, 4  ;;  %s365_s25 = int_to_ptr.hbm [resolvable:$true] %s364_s25 }
  0x17   : > { %v166_v0 = vld [vmem:[%s165_s28] sm:$0xf]  ;;  %s366_s26 = scalar_lea.hbm %s365_s25, 4  ;;  %s370_s28 = scalar_lea.hbm %s532_s3, 8 }
  0x18   : > { %v168_v1 = vsel %vm167_vm0, %v166_v0, 0.0  ;;  %v177_v2 = vmul.f32 %v166_v0, %v166_v0  ;;  %p367_p11 = scmp.ne.s32.totalorder %s365_s25, %s366_s26  ;;  %p371_p0 = scmp.lt.s32.totalorder %s365_s25, %s532_s3 }
  0x19   : > { %169 = vadd.xlane.f32.xlu0 %v168_v1  ;;  %p372_p1 = scmp.lt.s32.totalorder %s370_s28, %s366_s26 }
  0x1a   : > { %v178_v3 = vsel %vm167_vm0, %v177_v2, 0.0  ;;  %p368_p12 = pnand %p367_p11, %p473_p5 }
  0x1b   : > { %p373_p2 = por %p372_p1, %p371_p0 }
  0x1c   : > { %p369_p13 = pneg %p368_p12 }
  0x1e   : > { %p374_p3 = pnand %p373_p2, %p369_p13 }
  0x21   : > { %179 = vadd.xlane.f32.xlu0 %v178_v3 }
  0x8c   : > { %v170_v5 = vpop.xlane.xlu0 %169 }
  0x8d   : > { %v171_v6 = vrot.slane %v170_v5, 4 }
  0x8f   : > { %v172_v7 = vadd.f32 %v171_v6, %v170_v5 }
  0x91   : > { %v173_v8 = vrot.slane %v172_v7, 2 }
  0x93   : > { %v174_v9 = vadd.f32 %v173_v8, %v172_v7 }
  0x94   : > { %v180_v10 = vpop.xlane.xlu0 %179 }
  0x95   : > { %v175_v11 = vrot.slane %v174_v9, 1  ;;  %v181_v12 = vrot.slane %v180_v10, 4 }
  0x97   : > { %v182_v13 = vadd.f32 %v181_v12, %v180_v10  ;;  %v176_v14 = vadd.f32 %v175_v11, %v174_v9 }
  0x99   : > { %v183_v15 = vrot.slane %v182_v13, 2  ;;  %v187_v18 = vmul.f32 0.015625, %v176_v14 }
  0x9b   : > { %v184_v16 = vadd.f32 %v183_v15, %v182_v13  ;;  %v189_v21 = vmul.f32 %v187_v18, %v187_v18 }
  0x9d   : > { %v185_v17 = vrot.slane %v184_v16, 1 }
  0x9f   : > { %v186_v19 = vadd.f32 %v185_v17, %v184_v16 }
  0xa1   : > { %v188_v20 = vmul.f32 0.015625, %v186_v19 }
  0xa3   : > { %v190_v22 = vsub.f32 %v188_v20, %v189_v21 }
  0xa5   : > { %v191_v23 = vmax.f32 %v190_v22, 0.0 }
  0xa7   : > { %v192_v24 = vadd.f32 1e-08, %v191_v23 }
  0xa9   : > { %348 = vrsqrt.f32 %v192_v24  ;;  %vm199_vm2 = vweird.f32 %v192_v24 }
  0xaf   : > { %v349_v25 = vpop.eup %348 }
  0xb0   : > { %v194_v26 = vmul.f32 %v349_v25, %v192_v24  ;;  %vm200_vm1 = vweird.f32 %v349_v25 }
  0xb1   : > { %vm201_vm3 = vmor %vm199_vm2, %vm200_vm1 }
  0xb2   : > { %v195_v27 = vmul.f32 %v349_v25, %v194_v26 }
  0xb4   : > { %v196_v28 = vmul.f32 0.5, %v195_v27 }
  0xb6   : > { %v197_v29 = vsub.f32 1.5, %v196_v28 }
  0xb8   : > { %v198_v30 = vmul.f32 %v349_v25, %v197_v29 }
  0xba   : > { %v202_v32 = vsel %vm201_vm3, %v349_v25, %v198_v30 }
  0xbb   : > { %v205_v33 = vmul.f32 %v203_v31, %v202_v32 }
  0xbd   : > { %210 = vperm.xlu1 %346, %v205_v33   ;;  %v206_v34 = vmul.f32 %v205_v33, %v187_v18 }
  0xbf   : > { %v207_v36 = vsub.f32 %v204_v35, %v206_v34 }
  0xc5   : > { %216 = vperm.xlu1 %346, %v207_v36  }
 0x12f   : > { %v211_v37 = vpop.permute.xlu1 %210 }
 0x130   : > { %v213_v38 = vmul.f32 %v211_v37, %v166_v0 }
 0x137   : > { %v217_v39 = vpop.permute.xlu1 %216 }
 0x138   : > { %v219_v40 = vadd.f32 %v217_v39, %v213_v38 }
 0x13a   : > { %220 = vst.msk [vmem:[%s161_s17] sm:$0xf] %vm167_vm0, %v219_v40 }
 0x13b   : > { %377 = shalt.err (!%p374_p3)
}
 0x13c   : > { %306 = dma.vmem_to_hbm [thread:$0]  (%p473_p5), %s235_s19, 64, %s237_s20, %s222_s24  }
 0x13d PF: > { %p312_p4 = scmp.ge.s32.totalorder %s412_s15, 2  ;;  %s248_s4 = sand.u32 1, %s400_s12  }
 0x13e   : > { %s249_s5 = scalar_lea.sflag [#allocation3], %s248_s4 }
 0x13f   : > { %p309_p7 = pnand %p312_p4, %p477_p6 }
 0x141   : > { %p310_p8 = pneg %p309_p7 }
 0x143   : > { %395 = dma.done.wait (%p310_p8), %s249_s5, 64  }
 0x144   : > { %397 = vsyncadd (%p310_p8), %s249_s5, 4294967232  ;;  %p13_p9 = scmp.ge.s32.totalorder %s460_s18, 4   ;;  %s535_s12 = smov %s404_s13 }
 0x145   : > { %s536_s13 = smov %s408_s14  ;;  %s537_s14 = smov %s471_s21 }
 0x146   : > { %s538_s15 = smov %s460_s18  ;;  %15 = sbr.rel (!%p13_p9) target bundleno = 3 (0x3), region = 67 }
 0x14b   :  { %255 = vsyncpa [#allocation3], 1 }
 0x14c   :  { %257 = vsyncpa [#allocation3 + $0x1], 1 }

</bundles_post_ra>
